<compile_context>
chip_gen: v7x
topology: tpu7x:2x2x1
jax: 0.10.0
libtpu: 0.0.40
codegen_flags: <defaults>
</compile_context>

<pallas_src>
import functools

import jax
import jax.numpy as jnp
from jax import lax
from jax.experimental import pallas as pl
from jax.experimental.pallas import tpu as pltpu


def _root_kernel(*refs, num_inputs, compute_dtype):
    """refs = (x_0..x_{k-1}, w_0..w_{k-1}, shift, out).

    x_i : (C_i, block_hw)  input tile (batch dim squeezed)
    w_i : (Cout, C_i)      BN-scale-folded weight piece (already compute_dtype)
    shift: (Cout, 1)       folded BN shift (f32)
    out : (Cout, block_hw)
    """
    x_refs = refs[:num_inputs]
    w_refs = refs[num_inputs:2 * num_inputs]
    b_ref = refs[2 * num_inputs]
    o_ref = refs[2 * num_inputs + 1]

    acc = None
    for x_ref, w_ref in zip(x_refs, w_refs):
        part = jnp.dot(w_ref[...],
                       x_ref[...].astype(compute_dtype),
                       preferred_element_type=jnp.float32)
        acc = part if acc is None else acc + part

    # relu(acc + shift): f32 on the VPU, single lane-dense store.
    o_ref[...] = jnp.maximum(acc + b_ref[...], 0.0).astype(o_ref.dtype)


def _pick_block_hw(HW, cin, cout, bytes_per=4, vmem_budget=24 << 20):
    """Largest lane tile that fits a 2-deep double-buffer of x + out within
    `vmem_budget` (conservative vs. the 32 MiB default scoped VMEM on v7x).
    Returns either the full HW (allowed as a full-extent block) or a multiple
    of 128 used with a cdiv grid (padded/masked last tile)."""
    per_lane = 2 * 2 * (cin + cout) * bytes_per     # 2-deep buffers, x + out
    cap = max(128, (vmem_budget // per_lane) // 128 * 128)
    cap = min(cap, 65536)
    if HW <= cap:
        return HW                                    # full-extent block
    return cap                                       # 128-multiple, cdiv grid


def root_forward_pallas(xs_nchw, weight_oihw, scale, shift, *,
                        compute_dtype=jnp.bfloat16, out_dtype=None):
    """Fused Root forward.

    xs_nchw:      list of (N, C_i, H, W) arrays (PyTorch concatenates on dim 1).
    weight_oihw:  (Cout, Cin, 1, 1) conv weight (kernel_size=1, bias=False).
    scale, shift: (Cout,) folded eval-mode BatchNorm parameters.
    Returns (N, Cout, H, W), matching the PyTorch module layout.
    """
    N, _, H, W = xs_nchw[0].shape
    c_list = [int(x.shape[1]) for x in xs_nchw]
    Cin = sum(c_list)
    Cout, Cin_w, kh, kw = weight_oihw.shape
    assert Cin_w == Cin, (Cin_w, Cin)
    assert kh == 1 and kw == 1, "only kernel_size=1 is supported"
    HW = H * W
    if out_dtype is None:
        out_dtype = xs_nchw[0].dtype

    # Free reshapes only (contiguous NCHW): (N, C_i, H, W) -> (N, C_i, H*W).
    xs_flat = [x.reshape(N, c, HW) for x, c in zip(xs_nchw, c_list)]

    # Fold BN scale into the weight once, split along Cin to match xs pieces.
    w2d = weight_oihw.reshape(Cout, Cin).astype(jnp.float32) * scale.reshape(Cout, 1)
    offs = [0]
    for c in c_list:
        offs.append(offs[-1] + c)
    ws = [w2d[:, offs[i]:offs[i + 1]].astype(compute_dtype)
          for i in range(len(c_list))]
    b2d = shift.reshape(Cout, 1).astype(jnp.float32)

    block_hw = _pick_block_hw(HW, Cin, Cout)
    grid = (N, pl.cdiv(HW, block_hw))

    in_specs = (
        [pl.BlockSpec((pl.Squeezed(), c, block_hw), lambda n, hw: (n, 0, hw))
         for c in c_list]                                         # x tiles
        + [pl.BlockSpec((Cout, c), lambda n, hw: (0, 0)) for c in c_list]  # weights
        + [pl.BlockSpec((Cout, 1), lambda n, hw: (0, 0))]         # BN shift
    )
    out_spec = pl.BlockSpec((pl.Squeezed(), Cout, block_hw),
                            lambda n, hw: (n, 0, hw))

    kernel = functools.partial(_root_kernel, num_inputs=len(c_list),
                               compute_dtype=compute_dtype)
    out = pl.pallas_call(
        kernel,
        out_shape=jax.ShapeDtypeStruct((N, Cout, HW), out_dtype),
        grid_spec=pltpu.PrefetchScalarGridSpec(
            num_scalar_prefetch=0,
            grid=grid,
            in_specs=in_specs,
            out_specs=out_spec,
        ),
        compiler_params=pltpu.CompilerParams(
            dimension_semantics=("parallel", "parallel")),
    )(*xs_flat, *ws, b2d)

    # Free reshape back to NCHW.
    return out.reshape(N, Cout, H, W)


def fold_bn(gamma, beta, mean, var, eps=1e-5):
    scale = gamma / jnp.sqrt(var + eps)
    shift = beta - mean * scale
    return scale, shift


def root_forward_ref(xs_nchw, weight_oihw, gamma, beta, mean, var, eps=1e-5):
    """Pure-JAX reference (eval-mode BN), NCHW."""
    x = jnp.concatenate(xs_nchw, axis=1)
    y = lax.conv_general_dilated(
        x, weight_oihw, window_strides=(1, 1), padding="SAME",
        dimension_numbers=("NCHW", "OIHW", "NCHW"))
    inv = gamma / jnp.sqrt(var + eps)
    y = (y - mean[None, :, None, None]) * inv[None, :, None, None] \
        + beta[None, :, None, None]
    return jax.nn.relu(y)


if __name__ == "__main__":
    key = jax.random.PRNGKey(0)
    ks = jax.random.split(key, 8)

    # Root(in_channels=8, out_channels=16); forward(xs) with two (2,4,16,16) inputs.
    N, H, W = 2, 16, 16
    c_list = (4, 4)
    Cin = sum(c_list)
    Cout = 16

    xs = [jax.random.normal(ks[i], (N, c, H, W), jnp.float32)
          for i, c in enumerate(c_list)]

    w = 0.3 * jax.random.normal(ks[2], (Cout, Cin, 1, 1), jnp.float32)
    gamma = jax.random.uniform(ks[3], (Cout,), minval=0.5, maxval=1.5)
    beta = 0.1 * jax.random.normal(ks[4], (Cout,))
    mean = 0.1 * jax.random.normal(ks[5], (Cout,))
    var = jax.random.uniform(ks[6], (Cout,), minval=0.5, maxval=1.5)

    scale, shift = fold_bn(gamma, beta, mean, var)

    ref = jax.block_until_ready(root_forward_ref(xs, w, gamma, beta, mean, var))

    # f32-at-the-MXU path: tight check.
    out_f32 = root_forward_pallas(xs, w, scale, shift, compute_dtype=jnp.float32)
    out_f32 = jax.block_until_ready(out_f32)
    assert out_f32.shape == (N, Cout, H, W), out_f32.shape
    assert jnp.allclose(out_f32, ref, atol=1e-3, rtol=1e-3), \
        float(jnp.max(jnp.abs(out_f32 - ref)))

    # bf16-at-the-MXU fast path (default), f32 accumulation: loose check.
    out_bf16 = root_forward_pallas(xs, w, scale, shift)
    out_bf16 = jax.block_until_ready(out_bf16)
    assert out_bf16.shape == (N, Cout, H, W), out_bf16.shape
    assert float(jnp.max(jnp.abs(out_bf16 - ref))) < 1e-1, \
        float(jnp.max(jnp.abs(out_bf16 - ref)))

    print("KERNEL_OK")
</pallas_src>

<mosaic_0001>
module attributes {stable_mosaic.version = 11 : i64} {
  func.func @_root_kernel(%arg0: i32, %arg1: i32, %arg2: memref<1x4x256xf32, #tpu.memory_space<vmem>>, %arg3: memref<1x4x256xf32, #tpu.memory_space<vmem>>, %arg4: memref<16x4xf32, #tpu.memory_space<vmem>>, %arg5: memref<16x4xf32, #tpu.memory_space<vmem>>, %arg6: memref<16x1xf32, #tpu.memory_space<vmem>>, %arg7: memref<1x16x256xf32, #tpu.memory_space<vmem>>) attributes {dimension_semantics = [#tpu.dimension_semantics<parallel>, #tpu.dimension_semantics<parallel>], iteration_bounds = array<i64: 2, 1>, scalar_prefetch = 0 : i64, scratch_operands = 0 : i64, tpu.core_type = #tpu.core_type<tc>, window_params = [{transform_indices = @transform_0, window_bounds = array<i64: 1, 4, 256>}, {transform_indices = @transform_1, window_bounds = array<i64: 1, 4, 256>}, {pipeline_mode = #tpu.pipeline_mode<synchronous>, transform_indices = @transform_2, window_bounds = array<i64: 16, 4>}, {pipeline_mode = #tpu.pipeline_mode<synchronous>, transform_indices = @transform_3, window_bounds = array<i64: 16, 4>}, {pipeline_mode = #tpu.pipeline_mode<synchronous>, transform_indices = @transform_4, window_bounds = array<i64: 16, 1>}, {transform_indices = @transform_5, window_bounds = array<i64: 1, 16, 256>}]} {
    %c0 = arith.constant 0 : index
    %c0_0 = arith.constant 0 : index
    %0 = vector.load %arg4[%c0, %c0_0] : memref<16x4xf32, #tpu.memory_space<vmem>>, vector<16x4xf32>
    %c0_1 = arith.constant 0 : index
    %c0_2 = arith.constant 0 : index
    %c0_3 = arith.constant 0 : index
    %1 = vector.load %arg2[%c0_1, %c0_2, %c0_3] : memref<1x4x256xf32, #tpu.memory_space<vmem>>, vector<1x4x256xf32>
    %2 = vector.shape_cast %1 : vector<1x4x256xf32> to vector<4x256xf32>
    %cst = arith.constant dense<0.000000e+00> : vector<16x256xf32>
    %3 = tpu.matmul %0, %2, %cst {dimension_numbers = #tpu.dot_dimension_numbers<[1], [0], [0], [1], [0, 0, 1, 1], [], []>} : vector<16x4xf32>, vector<4x256xf32>, vector<16x256xf32> -> vector<16x256xf32>
    %c0_4 = arith.constant 0 : index
    %c0_5 = arith.constant 0 : index
    %4 = vector.load %arg5[%c0_4, %c0_5] : memref<16x4xf32, #tpu.memory_space<vmem>>, vector<16x4xf32>
    %c0_6 = arith.constant 0 : index
    %c0_7 = arith.constant 0 : index
    %c0_8 = arith.constant 0 : index
    %5 = vector.load %arg3[%c0_6, %c0_7, %c0_8] : memref<1x4x256xf32, #tpu.memory_space<vmem>>, vector<1x4x256xf32>
    %6 = vector.shape_cast %5 : vector<1x4x256xf32> to vector<4x256xf32>
    %cst_9 = arith.constant dense<0.000000e+00> : vector<16x256xf32>
    %7 = tpu.matmul %4, %6, %cst_9 {dimension_numbers = #tpu.dot_dimension_numbers<[1], [0], [0], [1], [0, 0, 1, 1], [], []>} : vector<16x4xf32>, vector<4x256xf32>, vector<16x256xf32> -> vector<16x256xf32>
    %8 = arith.addf %3, %7 : vector<16x256xf32>
    %c0_10 = arith.constant 0 : index
    %c0_11 = arith.constant 0 : index
    %9 = vector.load %arg6[%c0_10, %c0_11] : memref<16x1xf32, #tpu.memory_space<vmem>>, vector<16x1xf32>
    %10 = vector.broadcast %9 : vector<16x1xf32> to vector<16x256xf32>
    %11 = arith.addf %8, %10 : vector<16x256xf32>
    %cst_12 = arith.constant 0.000000e+00 : f32
    %12 = vector.broadcast %cst_12 : f32 to vector<16x256xf32>
    %13 = arith.maximumf %11, %12 : vector<16x256xf32>
    %c0_13 = arith.constant 0 : index
    %c0_14 = arith.constant 0 : index
    %c0_15 = arith.constant 0 : index
    %14 = vector.load %arg7[%c0_13, %c0_14, %c0_15] : memref<1x16x256xf32, #tpu.memory_space<vmem>>, vector<1x16x256xf32>
    %15 = vector.shape_cast %14 : vector<1x16x256xf32> to vector<16x256xf32>
    %16 = vector.shape_cast %13 : vector<16x256xf32> to vector<1x16x256xf32>
    tpu.vector_store %arg7[%c0_13, %c0_14, %c0_15], %16 {strides = array<i32>} : memref<1x16x256xf32, #tpu.memory_space<vmem>>, vector<1x16x256xf32>,
    return
  }
  func.func @transform_0(%arg0: i32, %arg1: i32) -> (i32, i32, i32) {
    %c0_i32 = arith.constant 0 : i32
    %c0_i32_0 = arith.constant 0 : i32
    return %arg0, %c0_i32, %arg1 : i32, i32, i32
  }
  func.func @transform_1(%arg0: i32, %arg1: i32) -> (i32, i32, i32) {
    %c0_i32 = arith.constant 0 : i32
    %c0_i32_0 = arith.constant 0 : i32
    return %arg0, %c0_i32, %arg1 : i32, i32, i32
  }
  func.func @transform_2(%arg0: i32, %arg1: i32) -> (i32, i32) {
    %c0_i32 = arith.constant 0 : i32
    %c0_i32_0 = arith.constant 0 : i32
    %c0_i32_1 = arith.constant 0 : i32
    return %c0_i32, %c0_i32_0 : i32, i32
  }
  func.func @transform_3(%arg0: i32, %arg1: i32) -> (i32, i32) {
    %c0_i32 = arith.constant 0 : i32
    %c0_i32_0 = arith.constant 0 : i32
    %c0_i32_1 = arith.constant 0 : i32
    return %c0_i32, %c0_i32_0 : i32, i32
  }
  func.func @transform_4(%arg0: i32, %arg1: i32) -> (i32, i32) {
    %c0_i32 = arith.constant 0 : i32
    %c0_i32_0 = arith.constant 0 : i32
    %c0_i32_1 = arith.constant 0 : i32
    return %c0_i32, %c0_i32_0 : i32, i32
  }
  func.func @transform_5(%arg0: i32, %arg1: i32) -> (i32, i32, i32) {
    %c0_i32 = arith.constant 0 : i32
    %c0_i32_0 = arith.constant 0 : i32
    return %arg0, %c0_i32, %arg1 : i32, i32, i32
  }
}

</mosaic_0001>

<bundles_post_ra>
// kernel: tpu_custom_call.1
= control target key start
LH: loop header
LB: loop body
LE: loop exit
PB: predicated region body
PF: predicated region fallthrough
CT: control target
= control target key end

     0   :  { %10 = vsyncpa [#allocation3], 0  ;;  %s960_s0 = inlined_call_operand.vmem [shape: f32[2,4,256], index: 0, kind: input, shape index: {}]   ;;  %s961_s1 = inlined_call_operand.vmem [shape: f32[2,4,256], index: 1, kind: input, shape index: {}]   ;;  %s962_s2 = inlined_call_operand.vmem [shape: f32[16,4], index: 2, kind: input, shape index: {}]   ;;  %s963_s3 = inlined_call_operand.vmem [shape: f32[16,4], index: 3, kind: input, shape index: {}]   ;;  %s964_s4 = inlined_call_operand.vmem [shape: f32[16,1], index: 4, kind: input, shape index: {}]   ;;  %s965_s5 = inlined_call_operand.hbm [shape: f32[2,16,256], index: 5, kind: output, shape index: {}]  }
   0x1   :  { %12 = vsyncpa [#allocation3 + $0x1], 0  ;;  %s820_s18 = smov 0   ;;  %s822_s19 = smov 0  }
   0x2   :  { %s824_s20 = smov 0   ;;  %s826_s21 = smov 0  }
   0x3   :  { %s828_s22 = smov 0   ;;  %s830_s23 = smov 0  }
   0x4 LB: > { %s613_s24 = sadd.s32 4294967295, %s783_s23   ;;  %s614_s25 = sadd.s32 4294967294, %s783_s23   ;;  %s783_s23 = sphi %s830_s23, %s18_s23   ;;  %s779_s22 = sphi %s828_s22, %s972_s22   ;;  %s775_s21 = sphi %s826_s21, %s971_s21   ;;  %s771_s20 = sphi %s824_s20, %s970_s20   ;;  %s767_s19 = sphi %s822_s19, %s969_s19   ;;  %s763_s18 = sphi %s820_s18, %s968_s18  }
   0x5   : > { %s30_s26 = sadd.s32 1, %s779_s22  ;;  %s158_s27 = sadd.s32 1, %s771_s20 }
   0x6   : > { %p32_p0 = scmp.ge.s32.totalorder %s30_s26, 2  ;;  %p168_p1 = scmp.ne.s32.totalorder %s771_s20, %s767_s19 }
   0x7   : > { %p169_p2 = scmp.eq.s32.totalorder %s613_s24, 1  ;;  %p174_p3 = scmp.ne.s32.totalorder %s767_s19, %s763_s18 }
   0x8   : > { %s974_s26 = smov (%p32_p0, %s30_s26), 0  ;;  %p175_p5 = scmp.eq.s32.totalorder %s614_s25, 1 }
   0x9   : > { %p860_p4 = por %p169_p2, %p168_p1  ;;  %s153_s29 = ssub.s32 %s779_s22, %s974_s26 }
   0xa   : > { %p617_p6 = scmp.ge.s32.totalorder %s783_s23, 1  ;;  %p156_p7 = scmp.eq.s32.totalorder %s153_s29, 0 }
   0xb   : > { %p867_p8 = por %p175_p5, %p174_p3  ;;  %p228_p9 = scmp.lt.s32.totalorder %s783_s23, 3 }
   0xc   : > { %s873_s6 = scalar_select %p156_p7, %s771_s20, %s158_s27  }
   0xd   : > { %p229_p10 = pnand %p617_p6, %p228_p9 }
   0xe   : > { %p270_p11 = scmp.lt.s32.totalorder (!%p229_p10), %s775_s21, 1  ;;  %v785_v0 = vmov (!%p229_p10), 0.0   ;;  %v476_v1 = vld [vmem:[%s964_s4] sm:$0xff] (!%p229_p10)  ;;  %v786_v2 = vmov (!%p229_p10), 0   ;;  %v477_v3 = vld [vmem:[%s964_s4 + $0x8] sm:$0xff] (!%p229_p10)  ;;  %vm305_vm0 = vcmask (!%p229_p10), 1043456  }
   0xf   : > { %232 = sbr.rel (%p229_p10) target bundleno = 270 (0x10e), region = 40  ;;  %374 = vmatprep.mubr.f32.mxu1 (!%p229_p10), %v785_v0  ;;  %463 = vmatprep.mubr.f32.mxu0 (!%p229_p10), %v785_v0  ;;  %v293_v8 = vld [vmem:[%s963_s3] sm:$0xff] (!%p229_p10)  ;;  %vm298_vm1 = vcmask (!%p229_p10), 31744   ;;  %v294_v10 = vld [vmem:[%s963_s3 + $0x8] sm:$0xff] (!%p229_p10)  ;;  %s266_s12 = sand.u32 (!%p229_p10), 1, %s767_s19  }
  0x10   : > { %702 = vset.pattern.permute.xlu0 (!%p229_p10), %v786_v2  ;;  %v290_v9 = vld [vmem:[%s962_s2] sm:$0xff] (!%p229_p10)  ;;  %v291_v11 = vld [vmem:[%s962_s2 + $0x8] sm:$0xff] (!%p229_p10)  ;;  %s618_s13 = sshll.u32 (!%p229_p10), %s266_s12, 5  ;;  %s638_s16 = sshll.u32 (!%p229_p10), %s775_s21, 9 }
  0x11   : > { %480 = vperm.xlu0 (!%p229_p10), %702, %v476_v1   ;;  %s268_s14 = scalar_lea.vmem (!%p229_p10), [#allocation2], %s618_s13  ;;  %s910_s25 = scalar_lea.hbm (!%p229_p10), %s965_s5, %s638_s16 }
  0x12   : > { %s787_s29 = smov (!%p229_p10), [#allocation2]  }
  0x13   : > { %s709_s7 = sshll.u32 (!%p229_p10), %s787_s29, 4  ;;  %s710_s7 = int_to_ptr.vmem [resolvable:$false] %s709_s7 }
  0x14   : > { %s711_s8 = scalar_lea.vmem (!%p229_p10), %s710_s7, 1024 }
  0x15   : > { %485 = vperm.xlu0 (!%p229_p10), %702, %v477_v3  }
  0x16   : > { %s271_s9 = scalar_select %p270_p11, %s775_s21, 1 }
  0x17   : > { %s914_s21 = scalar_lea.sflag [#allocation3], %s266_s12 }
  0x18   : > { %s636_s10 = sshll.u32 %s271_s9, 3 }
  0x19   : > { %s287_s15 = scalar_lea.vmem %s961_s1, %s636_s10  ;;  %s277_s24 = scalar_lea.vmem %s960_s0, %s636_s10 }
  0x1a   : > { %v295_v4 = vld [vmem:[%s287_s15] sm:$0xff]  ;;  %s516_s15 = sshll.u32 %s268_s14, 4  ;;  %s905_s15 = int_to_ptr.vmem [resolvable:$true] %s516_s15 }
  0x1b   : > { %v292_v5 = vld [vmem:[%s277_s24] sm:$0xff]  ;;  %v297_v6 = vcombine.high %v295_v4, %v295_v4  ;;  %s705_s27 = scalar_lea.vmem %s905_s15, 512  ;;  %p712_p1 = scmp.lt.s32.totalorder %s905_s15, %s710_s7 }
  0x1c   : > { %v388_v7 = vcombine.high %v292_v5, %v292_v5  ;;  %p706_p12 = scmp.ne.s32.totalorder %s905_s15, %s705_s27  ;;  %p713_p2 = scmp.lt.s32.totalorder %s711_s8, %s705_s27 }
  0x1d   : > { %623 = vmatprep.subr.msk.mxu1 %vm305_vm0, %v297_v6 }
  0x1e   : > { %627 = vmatprep.subr.msk.mxu0 %vm305_vm0, %v388_v7  ;;  %624 = vmatpush1.msk.msra.mxu1 %vm305_vm0, %v295_v4  ;;  %p707_p13 = pnand %p706_p12, %p860_p4  ;;  %p714_p3 = por %p713_p2, %p712_p1 }
  0x1f   : > { %628 = vmatpush1.msk.msra.mxu0 %vm305_vm0, %v292_v5  ;;  %625 = vmatmul.mubr.msk.f32.vlgmr.msra.gmra.mrb[0].mxu1 %vm298_vm1, %v293_v8 }
  0x20   : > { %629 = vmatmul.mubr.msk.f32.vlgmr.msra.gmra.mrb[0].mxu0 %vm298_vm1, %v290_v9  ;;  %380 = vmatprep.mubr.f32.mxu1 %v785_v0  ;;  %p708_p0 = pneg %p707_p13 }
  0x21   : > { %469 = vmatprep.mubr.f32.mxu0 %v785_v0 }
  0x22   : > { %p715_p5 = pnand %p714_p3, %p708_p0 }
  0x23   : > { %626 = vmatmul.mubr.msk.f32.gmra.mrb[2].mxu1 %vm298_vm1, %v294_v10 }
  0x24   : > { %630 = vmatmul.mubr.msk.f32.gmra.mrb[2].mxu0 %vm298_vm1, %v291_v11 }
  0x90   : > { %v481_v12 = vpop.permute.xlu0 %480 }
  0x94   : > { %v486_v28 = vpop.permute.xlu0 %485 }
  0xf2   : > { %v376_v13 = vpop.f32.mrb[0].mxu1 }
  0xf3   : > { %v465_v14 = vpop.f32.mrb[0].mxu0  ;;  %v378_v16 = vpop.f32.mrb[1].mxu1 }
  0xf4   : > { %v466_v15 = vadd.f32 %v465_v14, %v376_v13  ;;  %v467_v17 = vpop.f32.mrb[1].mxu0 }
  0xf5   : > { %v468_v18 = vadd.f32 %v467_v17, %v378_v16 }
  0xf6   : > { %v488_v19 = vadd.f32 %v481_v12, %v466_v15  ;;  %v382_v21 = vpop.f32.mrb[2].mxu1 }
  0xf7   : > { %v489_v20 = vadd.f32 %v481_v12, %v468_v18  ;;  %v471_v22 = vpop.f32.mrb[2].mxu0  ;;  %v384_v25 = vpop.f32.mrb[3].mxu1 }
  0xf8   : > { %v492_v23 = vmax.f32 %v488_v19, 0.0  ;;  %v472_v24 = vadd.f32 %v471_v22, %v382_v21  ;;  %v473_v26 = vpop.f32.mrb[3].mxu0 }
  0xf9   : > { %v493_v27 = vmax.f32 %v489_v20, 0.0  ;;  %v474_v29 = vadd.f32 %v473_v26, %v384_v25 }
  0xfa   : > { %496 = vst [vmem:[%s268_s14] sm:$0xff] %v492_v23  ;;  %v490_v30 = vadd.f32 %v486_v28, %v472_v24 }
  0xfb   : > { %497 = vst [vmem:[%s268_s14 + $0x8] sm:$0xff] %v493_v27  ;;  %v491_v31 = vadd.f32 %v486_v28, %v474_v29 }
  0xfc   : > { %v494_v32 = vmax.f32 %v490_v30, 0.0 }
  0xfd   : > { %v495_v33 = vmax.f32 %v491_v31, 0.0 }
  0xfe   : > { %498 = vst [vmem:[%s268_s14 + $0x10] sm:$0xff] %v494_v32 }
  0xff   : > { %499 = vst [vmem:[%s268_s14 + $0x18] sm:$0xff] %v495_v33 }
 0x100   : > { %718 = shalt.err (!%p715_p5)
}
 0x101   : > { %s719_s9 = scalar_lea.hbm %s910_s25, 512  ;;  %s723_s12 = scalar_lea.hbm %s965_s5, 1024 }
 0x102   : > { %p720_p6 = scmp.ne.s32.totalorder %s910_s25, %s719_s9  ;;  %p724_p10 = scmp.lt.u32.totalorder %s910_s25, %s965_s5 }
 0x103   : > { %p725_p11 = scmp.lt.u32.totalorder %s723_s12, %s719_s9  ;;  %p727_p13 = scmp.lt.u32.totalorder %s719_s9, %s910_s25 }
 0x104   : > { %p721_p7 = pnand %p720_p6, %p860_p4 }
 0x105   : > { %p726_p12 = por %p725_p11, %p724_p10 }
 0x106   : > { %p722_p9 = pneg %p721_p7 }
 0x107   : > { %p728_p0 = por %p727_p13, %p726_p12 }
 0x109   : > { %p729_p1 = pnand %p728_p0, %p722_p9 }
 0x10b   : > { %732 = shalt.err (!%p729_p1)
}
 0x10c   : > { %s788_s16 = smov 256   ;;  %s789_s17 = smov 16  }
 0x10d   : > { %643 = dma.vmem_to_hbm [thread:$0]  (%p860_p4), %s905_s15, 512, %s910_s25, %s914_s21, %s788_s16, %s788_s16, %s789_s17  }
 0x10e PF: > { %p649_p2 = scmp.ge.s32.totalorder %s783_s23, 2  ;;  %s531_s24 = sand.u32 1, %s763_s18  }
 0x10f   : > { %s532_s27 = scalar_lea.sflag [#allocation3], %s531_s24 }
 0x110   : > { %p646_p3 = pnand %p649_p2, %p867_p8 }
 0x112   : > { %758 = dma.done.wait (!%p646_p3), %s532_s27, 512  }
 0x113   : > { %760 = vsyncadd (!%p646_p3), %s532_s27, 4294966784  ;;  %s18_s23 = sadd.s32 1, %s783_s23   ;;  %s968_s18 = smov %s767_s19 }
 0x114   : > { %p15_p5 = scmp.ge.s32.totalorder %s18_s23, 4   ;;  %s969_s19 = smov %s771_s20 }
 0x115   : > { %s970_s20 = smov %s873_s6  ;;  %s971_s21 = smov %s779_s22 }
 0x116   : > { %s972_s22 = smov %s974_s26  ;;  %17 = sbr.rel (!%p15_p5) target bundleno = 4 (0x4), region = 78 }
 0x11d   :  { %537 = vsyncpa [#allocation3], 1 }
 0x11e   :  { %539 = vsyncpa [#allocation3 + $0x1], 1 }

</bundles_post_ra>
